<compile_context>
chip_gen: v7x
topology: tpu7x:2x2x1
jax: 0.10.0
libtpu: 0.0.40
codegen_flags: <defaults>
</compile_context>

<pallas_src>
import math
import functools

import numpy as np
import jax
import jax.numpy as jnp
from jax.experimental import pallas as pl
from jax.experimental.pallas import tpu as pltpu


# ----------------------------------------------------------------------------
# Static geometry (mirrors the PyTorch kernel/stride/padding arithmetic)
# ----------------------------------------------------------------------------
def _level_geometry(H, W, level):
    kh, kw = math.ceil(H / level), math.ceil(W / level)
    sh, sw = kh, kw
    ph = math.floor((kh * level - H + 1) / 2)
    pw = math.floor((kw * level - W + 1) / 2)
    oh = (H + 2 * ph - kh) // sh + 1
    ow = (W + 2 * pw - kw) // sw + 1
    return kh, kw, sh, sw, ph, pw, oh, ow


def _all_geometries(H, W, num_levels):
    geoms = []
    for i in range(num_levels):
        level = i + 1
        g = _level_geometry(H, W, level)
        kh, kw, sh, sw, ph, pw, oh, ow = g
        # PyTorch's pooling ops reject pad > kernel/2; mirror that instead of
        # silently computing a value (correctness-concern from review).
        if 2 * ph > kh or 2 * pw > kw:
            raise ValueError(
                f"SPP level {level}: padding ({ph},{pw}) exceeds half kernel "
                f"({kh},{kw}); PyTorch would reject this configuration.")
        geoms.append(g)
    return geoms


def _pick_nc_block(nc, hw, itemsize, budget_bytes=4 << 20):
    """Largest lane-aligned block of the fused N*C axis whose input tile fits a
    modest VMEM budget (the auto-pipeliner double-buffers it)."""
    for cand in (4096, 2048, 1024, 512, 256, 128):
        if nc % cand == 0 and hw * cand * itemsize <= budget_bytes:
            return cand
    return nc  # tiny inputs: single full block


# ----------------------------------------------------------------------------
# Kernels
# ----------------------------------------------------------------------------
def _spp_max_kernel(x_ref, o_ref, *, H, W, geoms):
    """x_ref: (H, W, bnc) block with fused N*C on lanes.
    o_ref: (sum(level^2), bnc) concatenated, lane-dense output."""
    off = 0
    for (kh, kw, sh, sw, ph, pw, oh, ow) in geoms:
        for oi in range(oh):
            rs = max(oi * sh - ph, 0)
            re = min(oi * sh - ph + kh, H)
            # Clipped window == -inf padding for max pooling.
            # Reduce over the leading (row) axis: plain VPU max across slabs.
            row = jnp.max(x_ref[rs:re], axis=0)                    # (W, bnc)
            for oj in range(ow):
                cs = max(oj * sw - pw, 0)
                ce = min(oj * sw - pw + kw, W)
                cell = jnp.max(row[cs:ce], axis=0, keepdims=True)  # (1, bnc)
                r = off + oi * ow + oj
                o_ref[r:r + 1, :] = cell.astype(o_ref.dtype)
        off += oh * ow


def _spp_avg_kernel(p_ref, x_ref, o_ref):
    """Whole pyramid as one MXU matmul: (cells, H*W) @ (H*W, bnc)."""
    o_ref[...] = jnp.dot(
        p_ref[...], x_ref[...], preferred_element_type=jnp.float32
    ).astype(o_ref.dtype)


def _avg_pool_matrix(H, W, geoms, dtype):
    """Static (sum(level^2), H*W) pooling weights.
    count_include_pad=True => fixed 1/(kh*kw) weight on valid pixels only."""
    total = sum(oh * ow for (*_, oh, ow) in geoms)
    pmat = np.zeros((total, H * W), dtype=np.float32)
    off = 0
    for (kh, kw, sh, sw, ph, pw, oh, ow) in geoms:
        inv = 1.0 / float(kh * kw)
        for oi in range(oh):
            rs = max(oi * sh - ph, 0)
            re = min(oi * sh - ph + kh, H)
            for oj in range(ow):
                cs = max(oj * sw - pw, 0)
                ce = min(oj * sw - pw + kw, W)
                row = off + oi * ow + oj
                for r in range(rs, re):
                    pmat[row, r * W + cs:r * W + ce] = inv
        off += oh * ow
    return jnp.asarray(pmat, dtype=dtype)


# ----------------------------------------------------------------------------
# Wrapper
# ----------------------------------------------------------------------------
def spp_layer(x, num_levels, pool_type='max_pool'):
    """Pallas implementation of SPPLayer.forward.  x: (N, C, H, W)."""
    N, C, H, W = x.shape
    geoms = _all_geometries(H, W, num_levels)
    total_cells = sum(oh * ow for (*_, oh, ow) in geoms)
    NC = N * C

    bnc = _pick_nc_block(NC, H * W, x.dtype.itemsize)
    grid = (NC // bnc,)
    cparams = pltpu.CompilerParams(dimension_semantics=("parallel",))

    if pool_type == 'max_pool':
        # (N, C, H, W) -> (H, W, N*C): fused channels on the 128-lane axis.
        xk = jnp.transpose(x, (2, 3, 0, 1)).reshape(H, W, NC)
        kernel = functools.partial(_spp_max_kernel, H=H, W=W, geoms=geoms)
        out = pl.pallas_call(
            kernel,
            grid=grid,
            in_specs=[pl.BlockSpec((H, W, bnc), lambda j: (0, 0, j))],
            out_specs=pl.BlockSpec((total_cells, bnc), lambda j: (0, j)),
            out_shape=jax.ShapeDtypeStruct((total_cells, NC), x.dtype),
            compiler_params=cparams,
        )(xk)
    elif pool_type == 'avg_pool':
        xk = jnp.transpose(x, (2, 3, 0, 1)).reshape(H * W, NC)
        pmat = _avg_pool_matrix(H, W, geoms, x.dtype)
        out = pl.pallas_call(
            _spp_avg_kernel,
            grid=grid,
            in_specs=[
                pl.BlockSpec((total_cells, H * W), lambda j: (0, 0)),
                pl.BlockSpec((H * W, bnc), lambda j: (0, j)),
            ],
            out_specs=pl.BlockSpec((total_cells, bnc), lambda j: (0, j)),
            out_shape=jax.ShapeDtypeStruct((total_cells, NC), x.dtype),
            compiler_params=cparams,
        )(pmat, xk)
    else:
        raise ValueError(f"unknown pool_type: {pool_type}")

    # Restore PyTorch ordering: per level (N, C*oh*ow) with C-major, then concat.
    out3 = out.reshape(total_cells, N, C)
    parts, off = [], 0
    for (*_, oh, ow) in geoms:
        n = oh * ow
        blk = out3[off:off + n]                               # (n, N, C)
        parts.append(jnp.transpose(blk, (1, 2, 0)).reshape(N, C * n))
        off += n
    return jnp.concatenate(parts, axis=1)


# ----------------------------------------------------------------------------
# Pure-JAX reference (mirrors the PyTorch forward) for sanity checking
# ----------------------------------------------------------------------------
def _spp_reference(x, num_levels, pool_type='max_pool'):
    N, C, H, W = x.shape
    feats = []
    for i in range(num_levels):
        level = i + 1
        kh, kw, sh, sw, ph, pw, oh, ow = _level_geometry(H, W, level)
        cells = []
        for oi in range(oh):
            rs = max(oi * sh - ph, 0)
            re = min(oi * sh - ph + kh, H)
            for oj in range(ow):
                cs = max(oj * sw - pw, 0)
                ce = min(oj * sw - pw + kw, W)
                win = x[:, :, rs:re, cs:ce]
                if pool_type == 'max_pool':
                    cells.append(jnp.max(win, axis=(2, 3)))
                else:
                    cells.append(jnp.sum(win, axis=(2, 3)) / float(kh * kw))
        feats.append(jnp.stack(cells, axis=-1).reshape(N, -1))
    return jnp.concatenate(feats, axis=1)


if __name__ == "__main__":
    key = jax.random.PRNGKey(0)
    N, C, H, W = 2, 4, 16, 16
    num_levels = 3
    x = jax.random.normal(key, (N, C, H, W), dtype=jnp.float32)

    expected_feat = C * sum((l + 1) ** 2 for l in range(num_levels))

    for pool_type in ("max_pool", "avg_pool"):
        out = jax.block_until_ready(spp_layer(x, num_levels, pool_type))
        assert out.shape == (N, expected_feat), (pool_type, out.shape)
        ref = _spp_reference(x, num_levels, pool_type)
        assert jnp.allclose(out, ref, atol=1e-5, rtol=1e-5), \
            f"mismatch vs reference ({pool_type})"

    print("KERNEL_OK")
</pallas_src>

<mosaic_0001>
module attributes {stable_mosaic.version = 11 : i64} {
  func.func @_spp_max_kernel(%arg0: i32, %arg1: memref<16x16x8xf32, #tpu.memory_space<vmem>>, %arg2: memref<14x8xf32, #tpu.memory_space<vmem>>) attributes {dimension_semantics = [#tpu.dimension_semantics<parallel>], iteration_bounds = array<i64: 1>, scalar_prefetch = 0 : i64, scratch_operands = 0 : i64, tpu.core_type = #tpu.core_type<tc>, window_params = [{transform_indices = @transform_0, window_bounds = array<i64: 16, 16, 8>}, {transform_indices = @transform_1, window_bounds = array<i64: 14, 8>}]} {
    %c0 = arith.constant 0 : index
    %c0_0 = arith.constant 0 : index
    %c0_1 = arith.constant 0 : index
    %0 = vector.load %arg1[%c0, %c0_0, %c0_1] : memref<16x16x8xf32, #tpu.memory_space<vmem>>, vector<16x16x8xf32>
    %cst = arith.constant dense<0xFF800000> : vector<16x8xf32>
    %1 = vector.multi_reduction <maximumf>, %0, %cst [0] : vector<16x16x8xf32> to vector<16x8xf32>
    %cst_2 = arith.constant dense<0xFF800000> : vector<8xf32>
    %2 = vector.multi_reduction <maximumf>, %1, %cst_2 [0] : vector<16x8xf32> to vector<8xf32>
    %3 = vector.shape_cast %2 : vector<8xf32> to vector<1x8xf32>
    %c0_3 = arith.constant 0 : index
    %c0_4 = arith.constant 0 : index
    %4 = vector.load %arg2[%c0_3, %c0_4] : memref<14x8xf32, #tpu.memory_space<vmem>>, vector<1x8xf32>
    tpu.vector_store %arg2[%c0_3, %c0_4], %3 {strides = array<i32>} : memref<14x8xf32, #tpu.memory_space<vmem>>, vector<1x8xf32>,
    %c0_5 = arith.constant 0 : index
    %c0_6 = arith.constant 0 : index
    %c0_7 = arith.constant 0 : index
    %5 = vector.load %arg1[%c0_5, %c0_6, %c0_7] : memref<16x16x8xf32, #tpu.memory_space<vmem>>, vector<8x16x8xf32>
    %cst_8 = arith.constant dense<0xFF800000> : vector<16x8xf32>
    %6 = vector.multi_reduction <maximumf>, %5, %cst_8 [0] : vector<8x16x8xf32> to vector<16x8xf32>
    %7 = vector.extract_strided_slice %6 {offsets = [0, 0], sizes = [8, 8], strides = [1, 1]} : vector<16x8xf32> to vector<8x8xf32>
    %cst_9 = arith.constant dense<0xFF800000> : vector<8xf32>
    %8 = vector.multi_reduction <maximumf>, %7, %cst_9 [0] : vector<8x8xf32> to vector<8xf32>
    %9 = vector.shape_cast %8 : vector<8xf32> to vector<1x8xf32>
    %c1 = arith.constant 1 : index
    %c0_10 = arith.constant 0 : index
    %10 = vector.load %arg2[%c1, %c0_10] : memref<14x8xf32, #tpu.memory_space<vmem>>, vector<1x8xf32>
    tpu.vector_store %arg2[%c1, %c0_10], %9 {strides = array<i32>} : memref<14x8xf32, #tpu.memory_space<vmem>>, vector<1x8xf32>,
    %11 = vector.extract_strided_slice %6 {offsets = [8, 0], sizes = [8, 8], strides = [1, 1]} : vector<16x8xf32> to vector<8x8xf32>
    %cst_11 = arith.constant dense<0xFF800000> : vector<8xf32>
    %12 = vector.multi_reduction <maximumf>, %11, %cst_11 [0] : vector<8x8xf32> to vector<8xf32>
    %13 = vector.shape_cast %12 : vector<8xf32> to vector<1x8xf32>
    %c2 = arith.constant 2 : index
    %c0_12 = arith.constant 0 : index
    %14 = vector.load %arg2[%c2, %c0_12] : memref<14x8xf32, #tpu.memory_space<vmem>>, vector<1x8xf32>
    tpu.vector_store %arg2[%c2, %c0_12], %13 {strides = array<i32>} : memref<14x8xf32, #tpu.memory_space<vmem>>, vector<1x8xf32>,
    %c8 = arith.constant 8 : index
    %c0_13 = arith.constant 0 : index
    %c0_14 = arith.constant 0 : index
    %15 = vector.load %arg1[%c8, %c0_13, %c0_14] : memref<16x16x8xf32, #tpu.memory_space<vmem>>, vector<8x16x8xf32>
    %cst_15 = arith.constant dense<0xFF800000> : vector<16x8xf32>
    %16 = vector.multi_reduction <maximumf>, %15, %cst_15 [0] : vector<8x16x8xf32> to vector<16x8xf32>
    %17 = vector.extract_strided_slice %16 {offsets = [0, 0], sizes = [8, 8], strides = [1, 1]} : vector<16x8xf32> to vector<8x8xf32>
    %cst_16 = arith.constant dense<0xFF800000> : vector<8xf32>
    %18 = vector.multi_reduction <maximumf>, %17, %cst_16 [0] : vector<8x8xf32> to vector<8xf32>
    %19 = vector.shape_cast %18 : vector<8xf32> to vector<1x8xf32>
    %c3 = arith.constant 3 : index
    %c0_17 = arith.constant 0 : index
    %20 = vector.load %arg2[%c3, %c0_17] : memref<14x8xf32, #tpu.memory_space<vmem>>, vector<1x8xf32>
    tpu.vector_store %arg2[%c3, %c0_17], %19 {strides = array<i32>} : memref<14x8xf32, #tpu.memory_space<vmem>>, vector<1x8xf32>,
    %21 = vector.extract_strided_slice %16 {offsets = [8, 0], sizes = [8, 8], strides = [1, 1]} : vector<16x8xf32> to vector<8x8xf32>
    %cst_18 = arith.constant dense<0xFF800000> : vector<8xf32>
    %22 = vector.multi_reduction <maximumf>, %21, %cst_18 [0] : vector<8x8xf32> to vector<8xf32>
    %23 = vector.shape_cast %22 : vector<8xf32> to vector<1x8xf32>
    %c4 = arith.constant 4 : index
    %c0_19 = arith.constant 0 : index
    %24 = vector.load %arg2[%c4, %c0_19] : memref<14x8xf32, #tpu.memory_space<vmem>>, vector<1x8xf32>
    tpu.vector_store %arg2[%c4, %c0_19], %23 {strides = array<i32>} : memref<14x8xf32, #tpu.memory_space<vmem>>, vector<1x8xf32>,
    %c0_20 = arith.constant 0 : index
    %c0_21 = arith.constant 0 : index
    %c0_22 = arith.constant 0 : index
    %25 = vector.load %arg1[%c0_20, %c0_21, %c0_22] : memref<16x16x8xf32, #tpu.memory_space<vmem>>, vector<5x16x8xf32>
    %cst_23 = arith.constant dense<0xFF800000> : vector<16x8xf32>
    %26 = vector.multi_reduction <maximumf>, %25, %cst_23 [0] : vector<5x16x8xf32> to vector<16x8xf32>
    %27 = vector.extract_strided_slice %26 {offsets = [0, 0], sizes = [5, 8], strides = [1, 1]} : vector<16x8xf32> to vector<5x8xf32>
    %cst_24 = arith.constant dense<0xFF800000> : vector<8xf32>
    %28 = vector.multi_reduction <maximumf>, %27, %cst_24 [0] : vector<5x8xf32> to vector<8xf32>
    %29 = vector.shape_cast %28 : vector<8xf32> to vector<1x8xf32>
    %c5 = arith.constant 5 : index
    %c0_25 = arith.constant 0 : index
    %30 = vector.load %arg2[%c5, %c0_25] : memref<14x8xf32, #tpu.memory_space<vmem>>, vector<1x8xf32>
    tpu.vector_store %arg2[%c5, %c0_25], %29 {strides = array<i32>} : memref<14x8xf32, #tpu.memory_space<vmem>>, vector<1x8xf32>,
    %31 = vector.extract_strided_slice %26 {offsets = [5, 0], sizes = [6, 8], strides = [1, 1]} : vector<16x8xf32> to vector<6x8xf32>
    %cst_26 = arith.constant dense<0xFF800000> : vector<8xf32>
    %32 = vector.multi_reduction <maximumf>, %31, %cst_26 [0] : vector<6x8xf32> to vector<8xf32>
    %33 = vector.shape_cast %32 : vector<8xf32> to vector<1x8xf32>
    %c6 = arith.constant 6 : index
    %c0_27 = arith.constant 0 : index
    %34 = vector.load %arg2[%c6, %c0_27] : memref<14x8xf32, #tpu.memory_space<vmem>>, vector<1x8xf32>
    tpu.vector_store %arg2[%c6, %c0_27], %33 {strides = array<i32>} : memref<14x8xf32, #tpu.memory_space<vmem>>, vector<1x8xf32>,
    %35 = vector.extract_strided_slice %26 {offsets = [11, 0], sizes = [5, 8], strides = [1, 1]} : vector<16x8xf32> to vector<5x8xf32>
    %cst_28 = arith.constant dense<0xFF800000> : vector<8xf32>
    %36 = vector.multi_reduction <maximumf>, %35, %cst_28 [0] : vector<5x8xf32> to vector<8xf32>
    %37 = vector.shape_cast %36 : vector<8xf32> to vector<1x8xf32>
    %c7 = arith.constant 7 : index
    %c0_29 = arith.constant 0 : index
    %38 = vector.load %arg2[%c7, %c0_29] : memref<14x8xf32, #tpu.memory_space<vmem>>, vector<1x8xf32>
    tpu.vector_store %arg2[%c7, %c0_29], %37 {strides = array<i32>} : memref<14x8xf32, #tpu.memory_space<vmem>>, vector<1x8xf32>,
    %c5_30 = arith.constant 5 : index
    %c0_31 = arith.constant 0 : index
    %c0_32 = arith.constant 0 : index
    %39 = vector.load %arg1[%c5_30, %c0_31, %c0_32] : memref<16x16x8xf32, #tpu.memory_space<vmem>>, vector<6x16x8xf32>
    %cst_33 = arith.constant dense<0xFF800000> : vector<16x8xf32>
    %40 = vector.multi_reduction <maximumf>, %39, %cst_33 [0] : vector<6x16x8xf32> to vector<16x8xf32>
    %41 = vector.extract_strided_slice %40 {offsets = [0, 0], sizes = [5, 8], strides = [1, 1]} : vector<16x8xf32> to vector<5x8xf32>
    %cst_34 = arith.constant dense<0xFF800000> : vector<8xf32>
    %42 = vector.multi_reduction <maximumf>, %41, %cst_34 [0] : vector<5x8xf32> to vector<8xf32>
    %43 = vector.shape_cast %42 : vector<8xf32> to vector<1x8xf32>
    %c8_35 = arith.constant 8 : index
    %c0_36 = arith.constant 0 : index
    %44 = vector.load %arg2[%c8_35, %c0_36] : memref<14x8xf32, #tpu.memory_space<vmem>>, vector<1x8xf32>
    tpu.vector_store %arg2[%c8_35, %c0_36], %43 {strides = array<i32>} : memref<14x8xf32, #tpu.memory_space<vmem>>, vector<1x8xf32>,
    %45 = vector.extract_strided_slice %40 {offsets = [5, 0], sizes = [6, 8], strides = [1, 1]} : vector<16x8xf32> to vector<6x8xf32>
    %cst_37 = arith.constant dense<0xFF800000> : vector<8xf32>
    %46 = vector.multi_reduction <maximumf>, %45, %cst_37 [0] : vector<6x8xf32> to vector<8xf32>
    %47 = vector.shape_cast %46 : vector<8xf32> to vector<1x8xf32>
    %c9 = arith.constant 9 : index
    %c0_38 = arith.constant 0 : index
    %48 = vector.load %arg2[%c9, %c0_38] : memref<14x8xf32, #tpu.memory_space<vmem>>, vector<1x8xf32>
    tpu.vector_store %arg2[%c9, %c0_38], %47 {strides = array<i32>} : memref<14x8xf32, #tpu.memory_space<vmem>>, vector<1x8xf32>,
    %49 = vector.extract_strided_slice %40 {offsets = [11, 0], sizes = [5, 8], strides = [1, 1]} : vector<16x8xf32> to vector<5x8xf32>
    %cst_39 = arith.constant dense<0xFF800000> : vector<8xf32>
    %50 = vector.multi_reduction <maximumf>, %49, %cst_39 [0] : vector<5x8xf32> to vector<8xf32>
    %51 = vector.shape_cast %50 : vector<8xf32> to vector<1x8xf32>
    %c10 = arith.constant 10 : index
    %c0_40 = arith.constant 0 : index
    %52 = vector.load %arg2[%c10, %c0_40] : memref<14x8xf32, #tpu.memory_space<vmem>>, vector<1x8xf32>
    tpu.vector_store %arg2[%c10, %c0_40], %51 {strides = array<i32>} : memref<14x8xf32, #tpu.memory_space<vmem>>, vector<1x8xf32>,
    %c11 = arith.constant 11 : index
    %c0_41 = arith.constant 0 : index
    %c0_42 = arith.constant 0 : index
    %53 = vector.load %arg1[%c11, %c0_41, %c0_42] : memref<16x16x8xf32, #tpu.memory_space<vmem>>, vector<5x16x8xf32>
    %cst_43 = arith.constant dense<0xFF800000> : vector<16x8xf32>
    %54 = vector.multi_reduction <maximumf>, %53, %cst_43 [0] : vector<5x16x8xf32> to vector<16x8xf32>
    %55 = vector.extract_strided_slice %54 {offsets = [0, 0], sizes = [5, 8], strides = [1, 1]} : vector<16x8xf32> to vector<5x8xf32>
    %cst_44 = arith.constant dense<0xFF800000> : vector<8xf32>
    %56 = vector.multi_reduction <maximumf>, %55, %cst_44 [0] : vector<5x8xf32> to vector<8xf32>
    %57 = vector.shape_cast %56 : vector<8xf32> to vector<1x8xf32>
    %c11_45 = arith.constant 11 : index
    %c0_46 = arith.constant 0 : index
    %58 = vector.load %arg2[%c11_45, %c0_46] : memref<14x8xf32, #tpu.memory_space<vmem>>, vector<1x8xf32>
    tpu.vector_store %arg2[%c11_45, %c0_46], %57 {strides = array<i32>} : memref<14x8xf32, #tpu.memory_space<vmem>>, vector<1x8xf32>,
    %59 = vector.extract_strided_slice %54 {offsets = [5, 0], sizes = [6, 8], strides = [1, 1]} : vector<16x8xf32> to vector<6x8xf32>
    %cst_47 = arith.constant dense<0xFF800000> : vector<8xf32>
    %60 = vector.multi_reduction <maximumf>, %59, %cst_47 [0] : vector<6x8xf32> to vector<8xf32>
    %61 = vector.shape_cast %60 : vector<8xf32> to vector<1x8xf32>
    %c12 = arith.constant 12 : index
    %c0_48 = arith.constant 0 : index
    %62 = vector.load %arg2[%c12, %c0_48] : memref<14x8xf32, #tpu.memory_space<vmem>>, vector<1x8xf32>
    tpu.vector_store %arg2[%c12, %c0_48], %61 {strides = array<i32>} : memref<14x8xf32, #tpu.memory_space<vmem>>, vector<1x8xf32>,
    %63 = vector.extract_strided_slice %54 {offsets = [11, 0], sizes = [5, 8], strides = [1, 1]} : vector<16x8xf32> to vector<5x8xf32>
    %cst_49 = arith.constant dense<0xFF800000> : vector<8xf32>
    %64 = vector.multi_reduction <maximumf>, %63, %cst_49 [0] : vector<5x8xf32> to vector<8xf32>
    %65 = vector.shape_cast %64 : vector<8xf32> to vector<1x8xf32>
    %c13 = arith.constant 13 : index
    %c0_50 = arith.constant 0 : index
    %66 = vector.load %arg2[%c13, %c0_50] : memref<14x8xf32, #tpu.memory_space<vmem>>, vector<1x8xf32>
    tpu.vector_store %arg2[%c13, %c0_50], %65 {strides = array<i32>} : memref<14x8xf32, #tpu.memory_space<vmem>>, vector<1x8xf32>,
    return
  }
  func.func @transform_0(%arg0: i32) -> (i32, i32, i32) {
    %c0_i32 = arith.constant 0 : i32
    %c0_i32_0 = arith.constant 0 : i32
    %c0_i32_1 = arith.constant 0 : i32
    return %c0_i32, %c0_i32_0, %arg0 : i32, i32, i32
  }
  func.func @transform_1(%arg0: i32) -> (i32, i32) {
    %c0_i32 = arith.constant 0 : i32
    %c0_i32_0 = arith.constant 0 : i32
    return %c0_i32, %arg0 : i32, i32
  }
}

</mosaic_0001>

<bundles_post_ra>
// kernel: tpu_custom_call.1
= control target key start
LH: loop header
LB: loop body
LE: loop exit
PB: predicated region body
PF: predicated region fallthrough
CT: control target
= control target key end

     0   :  { %vm40_vm0 = vcmask 64512   ;;  %vm267_vm1 = vcmask 61440   ;;  %vm276_vm2 = vcmask 64517   ;;  %vm278_vm3 = vcmask 59392   ;;  %s787_s0 = inlined_call_operand.vmem [shape: f32[16,16,8], index: 0, kind: input, shape index: {}]   ;;  %s788_s1 = inlined_call_operand.vmem [shape: f32[14,8], index: 1, kind: output, shape index: {}]  }
   0x1   :  { %v8_v0 = vld [vmem:[%s787_s0] sm:$0xff]  ;;  %v9_v1 = vld [vmem:[%s787_s0 + $0x8] sm:$0xff]  ;;  %v10_v2 = vld [vmem:[%s787_s0 + $0x10] sm:$0xff]  ;;  %vm288_vm4 = vcmask 64515   ;;  %vm112_vm5 = vcmask 57344  }
   0x2   :  { %v11_v3 = vld [vmem:[%s787_s0 + $0x18] sm:$0xff]  ;;  %v12_v4 = vld [vmem:[%s787_s0 + $0x20] sm:$0xff]  ;;  %v13_v5 = vld [vmem:[%s787_s0 + $0x28] sm:$0xff]  ;;  %v41_v6 = vsel %vm40_vm0, %v8_v0, -inf  ;;  %v42_v7 = vsel %vm40_vm0, %v10_v2, -inf  ;;  %v72_v8 = vsel %vm40_vm0, %v9_v1, -inf }
   0x3   :  { %v14_v9 = vld [vmem:[%s787_s0 + $0x30] sm:$0xff]  ;;  %v15_v10 = vld [vmem:[%s787_s0 + $0x38] sm:$0xff]  ;;  %v16_v11 = vld [vmem:[%s787_s0 + $0x40] sm:$0xff]  ;;  %v43_v12 = vsel %vm40_vm0, %v12_v4, -inf  ;;  %v73_v13 = vsel %vm40_vm0, %v11_v3, -inf  ;;  %v74_v14 = vsel %vm40_vm0, %v13_v5, -inf }
   0x4   :  { %v17_v15 = vld [vmem:[%s787_s0 + $0x48] sm:$0xff]  ;;  %v18_v16 = vld [vmem:[%s787_s0 + $0x50] sm:$0xff]  ;;  %v19_v17 = vld [vmem:[%s787_s0 + $0x58] sm:$0xff]  ;;  %v44_v18 = vmax.f32 %v41_v6, %v43_v12  ;;  %v45_v19 = vsel %vm40_vm0, %v14_v9, -inf  ;;  %v47_v20 = vsel %vm40_vm0, %v16_v11, -inf  ;;  %v75_v21 = vmax.f32 %v72_v8, %v74_v14 }
   0x5   :  { %v20_v22 = vld [vmem:[%s787_s0 + $0x60] sm:$0xff]  ;;  %v22_v23 = vld [vmem:[%s787_s0 + $0x70] sm:$0xff]  ;;  %v515_v24 = vmax.f32 %v42_v7, %v45_v19  ;;  %v518_v25 = vsel %vm40_vm0, %v18_v16, -inf  ;;  %v76_v26 = vsel %vm40_vm0, %v15_v10, -inf  ;;  %v78_v27 = vsel %vm40_vm0, %v17_v15, -inf  ;;  %v21_v28 = vld [vmem:[%s787_s0 + $0x68] sm:$0xff] }
   0x6   :  { %v23_v29 = vld [vmem:[%s787_s0 + $0x78] sm:$0xff]  ;;  %v24_v30 = vld [vmem:[%s787_s0 + $0x80] sm:$0xff]  ;;  %v531_v31 = vmax.f32 %v44_v18, %v47_v20  ;;  %v534_v32 = vsel %vm40_vm0, %v20_v22, -inf  ;;  %v537_v33 = vsel %vm40_vm0, %v22_v23, -inf  ;;  %v539_v34 = vmax.f32 %v73_v13, %v76_v26  ;;  %v26_v35 = vld [vmem:[%s787_s0 + $0x90] sm:$0xff] }
   0x7   :  { %v28_v36 = vld [vmem:[%s787_s0 + $0xa0] sm:$0xff]  ;;  %v50_v37 = vmax.f32 %v515_v24, %v518_v25  ;;  %v550_v38 = vsel %vm40_vm0, %v24_v30, -inf  ;;  %v552_v39 = vmax.f32 %v75_v21, %v78_v27  ;;  %v555_v40 = vsel %vm40_vm0, %v19_v17, -inf  ;;  %v25_v41 = vld [vmem:[%s787_s0 + $0x88] sm:$0xff]  ;;  %v30_v42 = vld [vmem:[%s787_s0 + $0xb0] sm:$0xff] }
   0x8   :  { %v52_v43 = vmax.f32 %v531_v31, %v534_v32  ;;  %v566_v44 = vsel %vm40_vm0, %v26_v35, -inf  ;;  %v569_v45 = vsel %vm40_vm0, %v28_v36, -inf  ;;  %v81_v46 = vmax.f32 %v539_v34, %v555_v40  ;;  %v27_v47 = vld [vmem:[%s787_s0 + $0x98] sm:$0xff]  ;;  %v32_v48 = vld [vmem:[%s787_s0 + $0xc0] sm:$0xff]  ;;  %v34_v49 = vld [vmem:[%s787_s0 + $0xd0] sm:$0xff] }
   0x9   :  { %v54_v50 = vmax.f32 %v50_v37, %v537_v33  ;;  %v584_v51 = vsel %vm40_vm0, %v30_v42, -inf  ;;  %v587_v52 = vsel %vm40_vm0, %v21_v28, -inf  ;;  %v590_v53 = vsel %vm40_vm0, %v23_v29, -inf  ;;  %v29_v54 = vld [vmem:[%s787_s0 + $0xa8] sm:$0xff]  ;;  %v31_v55 = vld [vmem:[%s787_s0 + $0xb8] sm:$0xff]  ;;  %v36_v56 = vld [vmem:[%s787_s0 + $0xe0] sm:$0xff] }
   0xa   :  { %v56_v57 = vmax.f32 %v52_v43, %v550_v38  ;;  %v603_v58 = vsel %vm40_vm0, %v32_v48, -inf  ;;  %v606_v59 = vsel %vm40_vm0, %v34_v49, -inf  ;;  %v83_v60 = vmax.f32 %v552_v39, %v587_v52  ;;  %v33_v61 = vld [vmem:[%s787_s0 + $0xc8] sm:$0xff]  ;;  %v35_v62 = vld [vmem:[%s787_s0 + $0xd8] sm:$0xff]  ;;  %v38_v63 = vld [vmem:[%s787_s0 + $0xf0] sm:$0xff] }
   0xb   :  { %v58_v0 = vmax.f32 %v54_v50, %v566_v44  ;;  %v621_v1 = vsel %vm40_vm0, %v36_v56, -inf  ;;  %v85_v2 = vmax.f32 %v81_v46, %v590_v53  ;;  %v625_v3 = vsel %vm40_vm0, %v25_v41, -inf  ;;  %v37_v4 = vld [vmem:[%s787_s0 + $0xe8] sm:$0xff]  ;;  %v39_v5 = vld [vmem:[%s787_s0 + $0xf8] sm:$0xff] }
   0xc   :  { %v60_v6 = vmax.f32 %v56_v57, %v569_v45  ;;  %v635_v7 = vsel %vm40_vm0, %v38_v63, -inf  ;;  %v87_v8 = vmax.f32 %v83_v60, %v625_v3  ;;  %v639_v9 = vsel %vm40_vm0, %v27_v47, -inf }
   0xd   :  { %v62_v10 = vmax.f32 %v58_v0, %v584_v51  ;;  %v89_v11 = vmax.f32 %v85_v2, %v639_v9  ;;  %v644_v12 = vsel %vm40_vm0, %v29_v54, -inf  ;;  %v647_v13 = vsel %vm40_vm0, %v31_v55, -inf }
   0xe   :  { %v64_v14 = vmax.f32 %v60_v6, %v603_v58  ;;  %v91_v15 = vmax.f32 %v87_v8, %v644_v12  ;;  %v652_v16 = vsel %vm40_vm0, %v33_v61, -inf  ;;  %v655_v17 = vsel %vm40_vm0, %v35_v62, -inf }
   0xf   :  { %v66_v18 = vmax.f32 %v62_v10, %v606_v59  ;;  %v93_v19 = vmax.f32 %v89_v11, %v647_v13  ;;  %v660_v20 = vsel %vm40_vm0, %v37_v4, -inf  ;;  %v663_v21 = vsel %vm40_vm0, %v39_v5, -inf }
  0x10   :  { %v68_v22 = vmax.f32 %v64_v14, %v621_v1  ;;  %v95_v23 = vmax.f32 %v91_v15, %v652_v16  ;;  %v144_v26 = vmax.f32 %v52_v43, %v54_v50  ;;  %v159_v27 = vmax.f32 %v83_v60, %v85_v2 }
  0x11   :  { %v70_v28 = vmax.f32 %v66_v18, %v635_v7  ;;  %v97_v29 = vmax.f32 %v93_v19, %v655_v17  ;;  %v196_v30 = vmax.f32 %v550_v38, %v569_v45  ;;  %v198_v35 = vmax.f32 %v566_v44, %v584_v51 }
  0x12   :  { %v99_v36 = vmax.f32 %v95_v23, %v660_v20  ;;  %v160_v37 = vsel %vm40_vm0, %v144_v26, -inf  ;;  %v168_v41 = vsel %vm40_vm0, %v159_v27, -inf  ;;  %v211_v42 = vmax.f32 %v625_v3, %v644_v12 }
  0x13   :  { %v71_v43 = vmax.f32 %v68_v22, %v70_v28  ;;  %v101_v46 = vmax.f32 %v97_v29, %v663_v21  ;;  %v161_v47 = vrot.slane %v160_v37, 4  ;;  %v169_v48 = vrot.slane %v168_v41, 4 }
  0x14   :  { %v200_v49 = vmax.f32 %v196_v30, %v603_v58  ;;  %v202_v50 = vmax.f32 %v198_v35, %v606_v59  ;;  %v213_v54 = vmax.f32 %v639_v9, %v647_v13  ;;  %v215_v55 = vmax.f32 %v211_v42, %v652_v16 }
  0x15   :  { %v102_v56 = vmax.f32 %v99_v36, %v101_v46  ;;  %v103_v57 = vsel %vm40_vm0, %v71_v43, -inf  ;;  %v162_v60 = vmax.f32 %v160_v37, %v161_v47  ;;  %v170_v61 = vmax.f32 %v168_v41, %v169_v48 }
  0x16   :  { %v204_v62 = vmax.f32 %v200_v49, %v621_v1  ;;  %v206_v63 = vmax.f32 %v202_v50, %v635_v7  ;;  %v217_v0 = vmax.f32 %v213_v54, %v655_v17  ;;  %v219_v2 = vmax.f32 %v215_v55, %v660_v20 }
  0x17   :  { %v104_v4 = vsel %vm40_vm0, %v102_v56, -inf  ;;  %v163_v5 = vrot.slane %v162_v60, 2  ;;  %v171_v6 = vrot.slane %v170_v61, 2  ;;  %v257_v8 = vmax.f32 %v531_v31, %v515_v24 }
  0x18   :  { %v105_v10 = vmax.f32 %v103_v57, %v104_v4  ;;  %v207_v11 = vmax.f32 %v204_v62, %v206_v63  ;;  %v221_v14 = vmax.f32 %v217_v0, %v663_v21  ;;  %v266_v15 = vmax.f32 %v552_v39, %v539_v34 }
  0x19   :  { %v164_v18 = vmax.f32 %v162_v60, %v163_v5  ;;  %v172_v19 = vmax.f32 %v170_v61, %v171_v6  ;;  %v268_v22 = vsel %vm267_vm1, %v257_v8, -inf  ;;  %v277_v23 = vsel %vm276_vm2, %v257_v8, -inf }
  0x1a   :  { %v106_v26 = vrot.slane %v105_v10, 4  ;;  %v223_v27 = vsel %vm40_vm0, %v207_v11, -inf  ;;  %v222_v28 = vmax.f32 %v219_v2, %v221_v14  ;;  %v269_v29 = vrot.slane %v268_v22, 4 }
  0x1b   :  { %v165_v30 = vrot.slane %v164_v18, 1  ;;  %v173_v24 = vrot.slane %v172_v19, 1  ;;  %v224_v31 = vrot.slane %v223_v27, 4  ;;  %v279_v35 = vsel %vm278_vm3, %v266_v15, -inf }
  0x1c   :  { %v107_v36 = vmax.f32 %v105_v10, %v106_v26  ;;  %v231_v37 = vsel %vm40_vm0, %v222_v28, -inf  ;;  %v270_v34 = vmax.f32 %v268_v22, %v269_v29  ;;  %v280_v39 = vmax.f32 %v277_v23, %v279_v35 }
  0x1d   :  { %v166_v41 = vmax.f32 %v164_v18, %v165_v30  ;;  %v174_v42 = vmax.f32 %v172_v19, %v173_v24  ;;  %v225_v43 = vmax.f32 %v223_v27, %v224_v31  ;;  %v232_v46 = vrot.slane %v231_v37, 4 }
  0x1e   :  { %v108_v47 = vrot.slane %v107_v36, 2  ;;  %v271_v48 = vrot.slane %v270_v34, 2  ;;  %v281_v49 = vrot.slane %v280_v39, 4  ;;  %v289_v50 = vsel %vm288_vm4, %v266_v15, -inf }
  0x1f   :  { %167 = vst.msk [vmem:[%s788_s1 + $0x1] sm:$0x1] %vm112_vm5, %v166_v41  ;;  %175 = vst.msk [vmem:[%s788_s1 + $0x2] sm:$0x1] %vm112_vm5, %v174_v42  ;;  %v226_v54 = vrot.slane %v225_v43, 2  ;;  %v233_v55 = vmax.f32 %v231_v37, %v232_v46  ;;  %v290_v56 = vrot.slane %v289_v50, 4  ;;  %v313_v57 = vmax.f32 %v518_v25, %v537_v33 }
  0x20   :  { %v109_v60 = vmax.f32 %v107_v36, %v108_v47  ;;  %v272_v61 = vmax.f32 %v270_v34, %v271_v48  ;;  %v282_v62 = vmax.f32 %v280_v39, %v281_v49  ;;  %v315_v63 = vmax.f32 %v534_v32, %v550_v38 }
  0x21   :  { %v227_v0 = vmax.f32 %v225_v43, %v226_v54  ;;  %v234_v2 = vrot.slane %v233_v55, 2  ;;  %v291_v4 = vmax.f32 %v289_v50, %v290_v56  ;;  %v317_v5 = vmax.f32 %v313_v57, %v566_v44 }
  0x22   :  { %v110_v6 = vrot.slane %v109_v60, 1  ;;  %v273_v8 = vrot.slane %v272_v61, 1  ;;  %v283_v10 = vrot.slane %v282_v62, 2  ;;  %v319_v11 = vmax.f32 %v315_v63, %v569_v45 }
  0x23   :  { %v228_v14 = vrot.slane %v227_v0, 1  ;;  %v235_v15 = vmax.f32 %v233_v55, %v234_v2  ;;  %v292_v18 = vrot.slane %v291_v4, 2  ;;  %v324_v25 = vmax.f32 %v555_v40, %v590_v53 }
  0x24   :  { %v111_v33 = vmax.f32 %v109_v60, %v110_v6  ;;  %v274_v19 = vmax.f32 %v272_v61, %v273_v8  ;;  %v284_v22 = vmax.f32 %v282_v62, %v283_v10  ;;  %v320_v32 = vmax.f32 %v317_v5, %v319_v11 }
  0x25   :  { %v229_v38 = vmax.f32 %v227_v0, %v228_v14  ;;  %v236_v23 = vrot.slane %v235_v15, 1  ;;  %v293_v26 = vmax.f32 %v291_v4, %v292_v18  ;;  %v326_v44 = vmax.f32 %v587_v52, %v625_v3 }
  0x26   :  { %113 = vst.msk [vmem:[%s788_s1] sm:$0x1] %vm112_vm5, %v111_v33  ;;  %275 = vst.msk [vmem:[%s788_s1 + $0x5] sm:$0x1] %vm112_vm5, %v274_v19  ;;  %v285_v40 = vrot.slane %v284_v22, 1  ;;  %v332_v45 = vsel %vm267_vm1, %v320_v32, -inf  ;;  %v328_v53 = vmax.f32 %v324_v25, %v639_v9  ;;  %v372_v24 = vmax.f32 %v584_v51, %v606_v59 }
  0x27   :  { %v340_v27 = vsel %vm276_vm2, %v320_v32, -inf  ;;  %230 = vst.msk [vmem:[%s788_s1 + $0x3] sm:$0x1] %vm112_vm5, %v229_v38  ;;  %v237_v52 = vmax.f32 %v235_v15, %v236_v23  ;;  %v294_v3 = vrot.slane %v293_v26, 1  ;;  %v333_v28 = vrot.slane %v332_v45, 4 }
  0x28   :  { %v330_v29 = vmax.f32 %v326_v44, %v644_v12  ;;  %v286_v30 = vmax.f32 %v284_v22, %v285_v40  ;;  %v374_v31 = vmax.f32 %v603_v58, %v621_v1  ;;  %v381_v9 = vmax.f32 %v647_v13, %v655_v17 }
  0x29   :  { %238 = vst.msk [vmem:[%s788_s1 + $0x4] sm:$0x1] %vm112_vm5, %v237_v52  ;;  %v295_v35 = vmax.f32 %v293_v26, %v294_v3  ;;  %v334_v36 = vmax.f32 %v332_v45, %v333_v28  ;;  %v383_v12 = vmax.f32 %v652_v16, %v660_v20  ;;  %v376_v51 = vmax.f32 %v372_v24, %v635_v7 }
  0x2a   :  { %v331_v37 = vmax.f32 %v328_v53, %v330_v29  ;;  %287 = vst.msk [vmem:[%s788_s1 + $0x6] sm:$0x1] %vm112_vm5, %v286_v30  ;;  %v385_v58 = vmax.f32 %v381_v9, %v663_v21 }
  0x2b   :  { %296 = vst.msk [vmem:[%s788_s1 + $0x7] sm:$0x1] %vm112_vm5, %v295_v35  ;;  %v335_v59 = vrot.slane %v334_v36, 2  ;;  %v377_v20 = vmax.f32 %v376_v51, %v374_v31 }
  0x2c   :  { %v341_v1 = vsel %vm278_vm3, %v331_v37, -inf  ;;  %v350_v13 = vsel %vm288_vm4, %v331_v37, -inf  ;;  %v386_v34 = vmax.f32 %v385_v58, %v383_v12 }
  0x2d   :  { %v342_v16 = vmax.f32 %v340_v27, %v341_v1  ;;  %v351_v17 = vrot.slane %v350_v13, 4  ;;  %v336_v39 = vmax.f32 %v334_v36, %v335_v59  ;;  %v387_v7 = vsel %vm267_vm1, %v377_v20, -inf }
  0x2e   :  { %v395_v21 = vsel %vm276_vm2, %v377_v20, -inf  ;;  %v388_v46 = vrot.slane %v387_v7, 4  ;;  %v396_v47 = vsel %vm278_vm3, %v386_v34, -inf  ;;  %v405_v48 = vsel %vm288_vm4, %v386_v34, -inf }
  0x2f   :  { %v343_v41 = vrot.slane %v342_v16, 4  ;;  %v352_v42 = vmax.f32 %v350_v13, %v351_v17  ;;  %v337_v43 = vrot.slane %v336_v39, 1  ;;  %v397_v54 = vmax.f32 %v395_v21, %v396_v47 }
  0x30   :  { %v406_v55 = vrot.slane %v405_v48, 4  ;;  %v389_v57 = vmax.f32 %v387_v7, %v388_v46 }
  0x31   :  { %v344_v49 = vmax.f32 %v342_v16, %v343_v41  ;;  %v353_v50 = vrot.slane %v352_v42, 2  ;;  %v338_v56 = vmax.f32 %v336_v39, %v337_v43  ;;  %v398_v62 = vrot.slane %v397_v54, 4 }
  0x32   :  { %v407_v63 = vmax.f32 %v405_v48, %v406_v55  ;;  %v390_v0 = vrot.slane %v389_v57, 2 }
  0x33   :  { %v345_v60 = vrot.slane %v344_v49, 2  ;;  %v354_v61 = vmax.f32 %v352_v42, %v353_v50  ;;  %339 = vst.msk [vmem:[%s788_s1 + $0x8] sm:$0x1] %vm112_vm5, %v338_v56  ;;  %v399_v5 = vmax.f32 %v397_v54, %v398_v62 }
  0x34   :  { %v408_v6 = vrot.slane %v407_v63, 2  ;;  %v391_v8 = vmax.f32 %v389_v57, %v390_v0 }
  0x35   :  { %v346_v2 = vmax.f32 %v344_v49, %v345_v60  ;;  %v355_v4 = vrot.slane %v354_v61, 1  ;;  %v400_v14 = vrot.slane %v399_v5, 2 }
  0x36   :  { %v409_v15 = vmax.f32 %v407_v63, %v408_v6  ;;  %v392_v18 = vrot.slane %v391_v8, 1 }
  0x37   :  { %v347_v10 = vrot.slane %v346_v2, 1  ;;  %v356_v11 = vmax.f32 %v354_v61, %v355_v4  ;;  %v401_v33 = vmax.f32 %v399_v5, %v400_v14 }
  0x38   :  { %v410_v19 = vrot.slane %v409_v15, 1  ;;  %v393_v22 = vmax.f32 %v391_v8, %v392_v18 }
  0x39   :  { %v348_v25 = vmax.f32 %v346_v2, %v347_v10  ;;  %357 = vst.msk [vmem:[%s788_s1 + $0xa] sm:$0x1] %vm112_vm5, %v356_v11  ;;  %v402_v32 = vrot.slane %v401_v33, 1 }
  0x3a   :  { %v411_v38 = vmax.f32 %v409_v15, %v410_v19  ;;  %394 = vst.msk [vmem:[%s788_s1 + $0xb] sm:$0x1] %vm112_vm5, %v393_v22 }
  0x3b   :  { %349 = vst.msk [vmem:[%s788_s1 + $0x9] sm:$0x1] %vm112_vm5, %v348_v25  ;;  %v403_v23 = vmax.f32 %v401_v33, %v402_v32 }
  0x3c   :  { %412 = vst.msk [vmem:[%s788_s1 + $0xd] sm:$0x1] %vm112_vm5, %v411_v38 }
  0x3d   :  { %404 = vst.msk [vmem:[%s788_s1 + $0xc] sm:$0x1] %vm112_vm5, %v403_v23 }

</bundles_post_ra>
